<compile_context>
chip_gen: v5e
topology: v5e:2x2
jax: 0.10.0
libtpu: 0.0.40
codegen_flags: <defaults>
</compile_context>

<pallas_src>
import functools

import jax
import jax.numpy as jnp
from jax.experimental import pallas as pl
from jax.experimental.pallas import tpu as pltpu

LANE = 128      # vreg lane width  (channel / contraction axes padded to this)
SUBLANE = 8     # vreg sublane height (time extents padded to a multiple of this)


def _round_up(n, m):
    return ((n + m - 1) // m) * m


# --------------------------------------------------------------------------
# Pallas kernel: one group of independent (batch, time-tile) units per grid step.
# --------------------------------------------------------------------------
def temporal_block_kernel(xcol_ref, w1_ref, w2_ref, wd_ref, b2_ref, o_ref, *,
                          kernel_size, dilation):
    ups, h1_rows, ck1 = xcol_ref.shape          # units/step, tile rows (+halo), packed K*Cin+1 -> 128
    _, tile_l, coutp = o_ref.shape
    K = kernel_size
    hist = h1_rows - tile_l                     # h1 history rows (>= padding)
    off2 = hist - (K - 1) * dilation            # >= 0 by construction

    xcol = xcol_ref[...]                        # (ups, H1, CK1) bf16, stays in vregs

    # ---- conv1 (+ b1 via the validity/bias lane): ONE depth-CK1 MXU matmul -----
    # Pre-sequence rows have all-zero lanes (incl. the bias lane) -> exactly 0 out,
    # which is what conv2's causal zero padding must see.  No mask needed.
    acc1 = jnp.dot(xcol.reshape(ups * h1_rows, ck1), w1_ref[...],
                   preferred_element_type=jnp.float32)
    h1 = jnp.maximum(acc1, 0.0).astype(xcol.dtype).reshape(ups, h1_rows, coutp)
    # TODO(synk): nn.Dropout(p=0.2) treated as identity (inference semantics).

    # ---- conv2: lane-concat im2col of K time-shifted slices of in-register h1 --
    # Each slice is a full 128-lane block, so the concat is vreg stacking (no
    # cross-lane repack); sublane-unaligned starts ride the XLU off the MXU path.
    hcol = jnp.concatenate(
        [h1[:, off2 + k * dilation: off2 + k * dilation + tile_l, :]
         for k in range(K)], axis=-1).reshape(ups * tile_l, K * coutp)
    acc2 = jnp.dot(hcol, w2_ref[...], preferred_element_type=jnp.float32)
    h2 = jnp.maximum(acc2 + b2_ref[...], 0.0)

    # ---- residual 1x1 conv (+ bd): reuse the same im2col rows, weights are zero
    # everywhere except the lag-0 lanes and the bias lane -> no lane slicing.
    xres = xcol[:, hist:, :].reshape(ups * tile_l, ck1)
    res = jnp.dot(xres, wd_ref[...], preferred_element_type=jnp.float32)

    o_ref[...] = jnp.maximum(h2 + res, 0.0).reshape(ups, tile_l, coutp)


# --------------------------------------------------------------------------
# Wrapper: layout plumbing (NCL <-> NLC, dense-packed im2col + halo tiling,
# weight packing, bf16 casts) and the gridded pallas_call.
# --------------------------------------------------------------------------
def temporal_block_pallas(x_ncl, w1, b1, w2, b2, wd, bd, *, kernel_size,
                          dilation, padding, tile_l=256,
                          compute_dtype=jnp.bfloat16):
    """x_ncl: (B, Cin, L) float32 -- PyTorch layout.  Returns (B, Cout, L) f32."""
    B, Cin, L = x_ncl.shape
    Cout = w1.shape[0]
    K = kernel_size
    assert padding == (K - 1) * dilation, "causal TCN requires padding == (K-1)*dilation"

    # ---- tiling choices -----------------------------------------------------
    TILE_L = min(_round_up(L, SUBLANE), _round_up(tile_l, SUBLANE))
    L_pad = _round_up(L, TILE_L)                 # L rounded up to whole tiles
    num_tiles = L_pad // TILE_L
    H1 = _round_up(TILE_L + padding, SUBLANE)    # conv1 rows / unit (incl. history)
    hist = H1 - TILE_L                           # history rows (>= padding)
    CoutP = _round_up(Cout, LANE)
    CK1 = _round_up(K * Cin + 1, LANE)           # packed conv1 contraction (+ bias lane)
    num_units = B * num_tiles

    # units per grid step: push the matmul M dim toward >= 512 rows (MXU depth),
    # constrained to divide num_units so the grid is exact.
    target_ups = max(1, 512 // TILE_L)
    ups = 1
    for d in range(min(target_ups, num_units), 0, -1):
        if num_units % d == 0:
            ups = d
            break
    grid = (num_units // ups,)

    # ---- dense-packed conv1 im2col (+ bias/validity lane), built once in XLA ---
    x_nlc = jnp.transpose(x_ncl, (0, 2, 1))                       # (B, L, Cin)
    x_p = jnp.pad(x_nlc, ((0, 0), (hist + padding, L_pad - L), (0, 0)))
    full_rows = L_pad + hist                                      # row j -> output time j - hist
    taps = [x_p[:, kk * dilation: kk * dilation + full_rows, :] for kk in range(K)]
    valid = (jnp.arange(full_rows) >= hist).astype(x_nlc.dtype)   # 1.0 where time >= 0
    valid = jnp.broadcast_to(valid[None, :, None], (B, full_rows, 1))
    a = jnp.concatenate(taps + [valid], axis=-1)                  # (B, full_rows, K*Cin+1)
    a = jnp.pad(a, ((0, 0), (0, 0), (0, CK1 - (K * Cin + 1)))).astype(compute_dtype)
    # overlapping (halo) time tiles -> independent units
    units = jnp.stack([a[:, t * TILE_L: t * TILE_L + H1, :] for t in range(num_tiles)],
                      axis=1)
    xcol = units.reshape(num_units, H1, CK1)

    # ---- weight packing -------------------------------------------------------
    # conv1: row kk*Cin + ci = w1[:, ci, kk];  row K*Cin = b1 (bias lane); rest 0.
    w1_rows = jnp.transpose(w1, (2, 1, 0)).reshape(K * Cin, Cout)
    w1_rows = jnp.concatenate([w1_rows, b1[None, :]], axis=0)
    w1_mat = jnp.pad(w1_rows, ((0, CK1 - (K * Cin + 1)), (0, CoutP - Cout))
                     ).astype(compute_dtype)

    # downsample 1x1 conv packed against the SAME im2col: weights at the lag-0 tap
    # (kk = K-1) lanes, bd at the bias lane, zeros elsewhere.
    wd_rows = jnp.zeros((CK1, Cout), jnp.float32)
    wd_rows = wd_rows.at[(K - 1) * Cin:(K - 1) * Cin + Cin, :].set(wd[:, :, 0].T)
    wd_rows = wd_rows.at[K * Cin, :].set(bd)
    wd_mat = jnp.pad(wd_rows, ((0, 0), (0, CoutP - Cout))).astype(compute_dtype)

    # conv2: per-tap CoutP blocks on the contraction axis (matches in-kernel concat).
    w2_k = jnp.transpose(w2, (2, 1, 0))                           # (K, Cout, Cout)
    w2_k = jnp.pad(w2_k, ((0, 0), (0, CoutP - Cout), (0, CoutP - Cout)))
    w2_mat = w2_k.reshape(K * CoutP, CoutP).astype(compute_dtype)

    b2_row = jnp.pad(b2, (0, CoutP - Cout)).reshape(1, CoutP).astype(jnp.float32)

    # ---- cost estimate + VMEM sizing ------------------------------------------
    m1 = num_units * H1
    m2 = num_units * TILE_L
    flops = 2 * m1 * CK1 * CoutP + 2 * m2 * (K * CoutP) * CoutP + 2 * m2 * CK1 * CoutP
    bytes_accessed = (num_units * H1 * CK1 * 2                   # xcol (bf16)
                      + (2 * CK1 * CoutP + K * CoutP * CoutP) * 2 + CoutP * 4   # weights
                      + num_units * TILE_L * CoutP * 4)          # output (f32)
    cost = pl.CostEstimate(flops=flops, transcendentals=0, bytes_accessed=bytes_accessed)

    per_step_bytes = (
        2 * ups * H1 * CK1 * 2                    # xcol block, double-buffered, bf16
        + 2 * ups * TILE_L * CoutP * 4            # output block, double-buffered, f32
        + (2 * CK1 * CoutP + K * CoutP * CoutP) * 2 + CoutP * 4   # resident weights
        + ups * H1 * CoutP * (4 + 2)              # acc1 (f32) + h1 (bf16)
        + ups * TILE_L * (K * CoutP * 2 + CoutP * 12))            # hcol + acc2/res/out
    vmem_limit = int(min(96 * 2 ** 20, max(16 * 2 ** 20, 2 * per_step_bytes)))

    # ---- gridded pallas_call ---------------------------------------------------
    out_units = pl.pallas_call(
        functools.partial(temporal_block_kernel, kernel_size=K, dilation=dilation),
        out_shape=jax.ShapeDtypeStruct((num_units, TILE_L, CoutP), jnp.float32),
        grid=grid,
        in_specs=[
            pl.BlockSpec((ups, H1, CK1), lambda g: (g, 0, 0)),        # moving input
            pl.BlockSpec((CK1, CoutP), lambda g: (0, 0)),             # w1 (resident)
            pl.BlockSpec((K * CoutP, CoutP), lambda g: (0, 0)),       # w2 (resident)
            pl.BlockSpec((CK1, CoutP), lambda g: (0, 0)),             # wd (resident)
            pl.BlockSpec((1, CoutP), lambda g: (0, 0)),               # b2 (resident)
        ],
        out_specs=pl.BlockSpec((ups, TILE_L, CoutP), lambda g: (g, 0, 0)),
        compiler_params=pltpu.CompilerParams(
            dimension_semantics=("parallel",),       # independent units -> megacore on v7x
            vmem_limit_bytes=vmem_limit),
        cost_estimate=cost,
    )(xcol, w1_mat, w2_mat, wd_mat, b2_row)

    # strip time/channel padding, back to NCL
    out = out_units.reshape(B, num_tiles * TILE_L, CoutP)[:, :L, :Cout]
    return jnp.transpose(out, (0, 2, 1))


# --------------------------------------------------------------------------
# Pure-JAX reference (mirrors the PyTorch forward; same bf16 operand / f32
# accumulation scheme as the kernel) for correctness checking.
# --------------------------------------------------------------------------
def temporal_block_ref(x_ncl, w1, b1, w2, b2, wd, bd, *, dilation, padding,
                       compute_dtype=jnp.float32):
    cd = compute_dtype

    def causal_conv(inp, w, b):
        y = jax.lax.conv_general_dilated(
            inp.astype(cd), w.astype(cd), window_strides=(1,),
            padding=[(padding, padding)], rhs_dilation=(dilation,),
            dimension_numbers=('NCH', 'OIH', 'NCH'),
            preferred_element_type=jnp.float32)
        y = y + b[None, :, None].astype(jnp.float32)
        return y[:, :, :inp.shape[2]]            # Chomp1d(padding)

    h = jax.nn.relu(causal_conv(x_ncl, w1, b1))
    h = jax.nn.relu(causal_conv(h, w2, b2))
    res = jax.lax.conv_general_dilated(
        x_ncl.astype(cd), wd.astype(cd), window_strides=(1,), padding=[(0, 0)],
        dimension_numbers=('NCH', 'OIH', 'NCH'),
        preferred_element_type=jnp.float32) + bd[None, :, None]
    return jax.nn.relu(h + res)


def weight_norm_effective(v, g):
    """PyTorch weight_norm (dim=0): w = g * v / ||v||, norm over all dims but 0."""
    norm = jnp.sqrt(jnp.sum(v * v, axis=(1, 2), keepdims=True))
    return g[:, None, None] * v / norm


if __name__ == "__main__":
    # Small shapes consistent with the module's forward: x is (B, Cin, L).
    B, Cin, Cout, L = 2, 4, 8, 16
    K, stride, dilation = 3, 1, 2
    padding = (K - 1) * dilation                 # 4 — standard causal TCN choice

    key = jax.random.PRNGKey(0)
    ks = jax.random.split(key, 9)

    # weight-normed conv1 / conv2 parameters (v ~ N(0, 0.01), g > 0)
    v1 = 0.01 * jax.random.normal(ks[0], (Cout, Cin, K), jnp.float32)
    g1 = 0.5 + jax.random.uniform(ks[1], (Cout,), jnp.float32)
    v2 = 0.01 * jax.random.normal(ks[2], (Cout, Cout, K), jnp.float32)
    g2 = 0.5 + jax.random.uniform(ks[3], (Cout,), jnp.float32)
    w1 = weight_norm_effective(v1, g1)
    w2 = weight_norm_effective(v2, g2)
    b1 = 0.1 * jax.random.normal(ks[4], (Cout,), jnp.float32)
    b2 = 0.1 * jax.random.normal(ks[5], (Cout,), jnp.float32)

    # downsample 1x1 conv (Cin != Cout), weight ~ N(0, 0.01)
    wd = 0.01 * jax.random.normal(ks[6], (Cout, Cin, 1), jnp.float32)
    bd = 0.1 * jax.random.normal(ks[7], (Cout,), jnp.float32)

    x = jax.random.normal(ks[8], (B, Cin, L), jnp.float32)

    out = temporal_block_pallas(x, w1, b1, w2, b2, wd, bd,
                                kernel_size=K, dilation=dilation,
                                padding=padding)
    out = jax.block_until_ready(out)

    # Reference with the same bf16 operand rounding / f32 accumulation as the kernel.
    ref = temporal_block_ref(x, w1, b1, w2, b2, wd, bd,
                             dilation=dilation, padding=padding,
                             compute_dtype=jnp.bfloat16)
    ref = jax.block_until_ready(ref)

    assert out.shape == (B, Cout, L), out.shape
    max_err = float(jnp.max(jnp.abs(out - ref)))
    assert jnp.allclose(out, ref, rtol=1e-2, atol=1e-2), max_err
    print("KERNEL_OK")
</pallas_src>

<mosaic_0001>
module attributes {stable_mosaic.version = 11 : i64} {
  func.func @temporal_block_kernel(%arg0: i32, %arg1: memref<2x24x128xbf16, #tpu.memory_space<vmem>>, %arg2: memref<128x128xbf16, #tpu.memory_space<vmem>>, %arg3: memref<384x128xbf16, #tpu.memory_space<vmem>>, %arg4: memref<128x128xbf16, #tpu.memory_space<vmem>>, %arg5: memref<1x128xf32, #tpu.memory_space<vmem>>, %arg6: memref<2x16x128xf32, #tpu.memory_space<vmem>>) attributes {dimension_semantics = [#tpu.dimension_semantics<parallel>], iteration_bounds = array<i64: 1>, scalar_prefetch = 0 : i64, scratch_operands = 0 : i64, tpu.core_type = #tpu.core_type<tc>, window_params = [{transform_indices = @transform_0, window_bounds = array<i64: 2, 24, 128>}, {pipeline_mode = #tpu.pipeline_mode<synchronous>, transform_indices = @transform_1, window_bounds = array<i64: 128, 128>}, {pipeline_mode = #tpu.pipeline_mode<synchronous>, transform_indices = @transform_2, window_bounds = array<i64: 384, 128>}, {pipeline_mode = #tpu.pipeline_mode<synchronous>, transform_indices = @transform_3, window_bounds = array<i64: 128, 128>}, {pipeline_mode = #tpu.pipeline_mode<synchronous>, transform_indices = @transform_4, window_bounds = array<i64: 1, 128>}, {transform_indices = @transform_5, window_bounds = array<i64: 2, 16, 128>}]} {
    %c0 = arith.constant 0 : index
    %c0_0 = arith.constant 0 : index
    %c0_1 = arith.constant 0 : index
    %0 = vector.load %arg1[%c0, %c0_0, %c0_1] : memref<2x24x128xbf16, #tpu.memory_space<vmem>>, vector<2x24x128xbf16>
    %1 = vector.shape_cast %0 : vector<2x24x128xbf16> to vector<48x128xbf16>
    %c0_2 = arith.constant 0 : index
    %c0_3 = arith.constant 0 : index
    %2 = vector.load %arg2[%c0_2, %c0_3] : memref<128x128xbf16, #tpu.memory_space<vmem>>, vector<128x128xbf16>
    %cst = arith.constant dense<0.000000e+00> : vector<48x128xf32>
    %3 = tpu.matmul %1, %2, %cst {dimension_numbers = #tpu.dot_dimension_numbers<[1], [0], [0], [1], [0, 0, 1, 1], [], []>} : vector<48x128xbf16>, vector<128x128xbf16>, vector<48x128xf32> -> vector<48x128xf32>
    %cst_4 = arith.constant 0.000000e+00 : f32
    %4 = vector.broadcast %cst_4 : f32 to vector<48x128xf32>
    %5 = arith.maximumf %3, %4 : vector<48x128xf32>
    %6 = arith.truncf %5 : vector<48x128xf32> to vector<48x128xbf16>
    %7 = vector.shape_cast %6 : vector<48x128xbf16> to vector<2x24x128xbf16>
    %8 = vector.extract_strided_slice %7 {offsets = [0, 4, 0], sizes = [2, 16, 128], strides = [1, 1, 1]} : vector<2x24x128xbf16> to vector<2x16x128xbf16>
    %9 = vector.extract_strided_slice %7 {offsets = [0, 6, 0], sizes = [2, 16, 128], strides = [1, 1, 1]} : vector<2x24x128xbf16> to vector<2x16x128xbf16>
    %10 = vector.extract_strided_slice %7 {offsets = [0, 8, 0], sizes = [2, 16, 128], strides = [1, 1, 1]} : vector<2x24x128xbf16> to vector<2x16x128xbf16>
    %11 = tpu.concatenate %8, %9, %10 in 2 : vector<2x16x128xbf16>, vector<2x16x128xbf16>, vector<2x16x128xbf16> -> vector<2x16x384xbf16>
    %12 = vector.shape_cast %11 : vector<2x16x384xbf16> to vector<32x384xbf16>
    %c0_5 = arith.constant 0 : index
    %c0_6 = arith.constant 0 : index
    %13 = vector.load %arg3[%c0_5, %c0_6] : memref<384x128xbf16, #tpu.memory_space<vmem>>, vector<384x128xbf16>
    %cst_7 = arith.constant dense<0.000000e+00> : vector<32x128xf32>
    %14 = tpu.matmul %12, %13, %cst_7 {dimension_numbers = #tpu.dot_dimension_numbers<[1], [0], [0], [1], [0, 0, 1, 1], [], []>} : vector<32x384xbf16>, vector<384x128xbf16>, vector<32x128xf32> -> vector<32x128xf32>
    %c0_8 = arith.constant 0 : index
    %c0_9 = arith.constant 0 : index
    %15 = vector.load %arg5[%c0_8, %c0_9] : memref<1x128xf32, #tpu.memory_space<vmem>>, vector<1x128xf32>
    %16 = vector.broadcast %15 : vector<1x128xf32> to vector<32x128xf32>
    %17 = arith.addf %14, %16 : vector<32x128xf32>
    %cst_10 = arith.constant 0.000000e+00 : f32
    %18 = vector.broadcast %cst_10 : f32 to vector<32x128xf32>
    %19 = arith.maximumf %17, %18 : vector<32x128xf32>
    %20 = vector.extract_strided_slice %0 {offsets = [0, 8, 0], sizes = [2, 16, 128], strides = [1, 1, 1]} : vector<2x24x128xbf16> to vector<2x16x128xbf16>
    %21 = vector.shape_cast %20 : vector<2x16x128xbf16> to vector<32x128xbf16>
    %c0_11 = arith.constant 0 : index
    %c0_12 = arith.constant 0 : index
    %22 = vector.load %arg4[%c0_11, %c0_12] : memref<128x128xbf16, #tpu.memory_space<vmem>>, vector<128x128xbf16>
    %cst_13 = arith.constant dense<0.000000e+00> : vector<32x128xf32>
    %23 = tpu.matmul %21, %22, %cst_13 {dimension_numbers = #tpu.dot_dimension_numbers<[1], [0], [0], [1], [0, 0, 1, 1], [], []>} : vector<32x128xbf16>, vector<128x128xbf16>, vector<32x128xf32> -> vector<32x128xf32>
    %24 = arith.addf %19, %23 : vector<32x128xf32>
    %cst_14 = arith.constant 0.000000e+00 : f32
    %25 = vector.broadcast %cst_14 : f32 to vector<32x128xf32>
    %26 = arith.maximumf %24, %25 : vector<32x128xf32>
    %27 = vector.shape_cast %26 : vector<32x128xf32> to vector<2x16x128xf32>
    %c0_15 = arith.constant 0 : index
    %c0_16 = arith.constant 0 : index
    %c0_17 = arith.constant 0 : index
    %28 = vector.load %arg6[%c0_15, %c0_16, %c0_17] : memref<2x16x128xf32, #tpu.memory_space<vmem>>, vector<2x16x128xf32>
    tpu.vector_store %arg6[%c0_15, %c0_16, %c0_17], %27 {strides = array<i32>} : memref<2x16x128xf32, #tpu.memory_space<vmem>>, vector<2x16x128xf32>,
    return
  }
  func.func @transform_0(%arg0: i32) -> (i32, i32, i32) {
    %c0_i32 = arith.constant 0 : i32
    %c0_i32_0 = arith.constant 0 : i32
    %c0_i32_1 = arith.constant 0 : i32
    return %arg0, %c0_i32, %c0_i32_0 : i32, i32, i32
  }
  func.func @transform_1(%arg0: i32) -> (i32, i32) {
    %c0_i32 = arith.constant 0 : i32
    %c0_i32_0 = arith.constant 0 : i32
    %c0_i32_1 = arith.constant 0 : i32
    return %c0_i32, %c0_i32_0 : i32, i32
  }
  func.func @transform_2(%arg0: i32) -> (i32, i32) {
    %c0_i32 = arith.constant 0 : i32
    %c0_i32_0 = arith.constant 0 : i32
    %c0_i32_1 = arith.constant 0 : i32
    return %c0_i32, %c0_i32_0 : i32, i32
  }
  func.func @transform_3(%arg0: i32) -> (i32, i32) {
    %c0_i32 = arith.constant 0 : i32
    %c0_i32_0 = arith.constant 0 : i32
    %c0_i32_1 = arith.constant 0 : i32
    return %c0_i32, %c0_i32_0 : i32, i32
  }
  func.func @transform_4(%arg0: i32) -> (i32, i32) {
    %c0_i32 = arith.constant 0 : i32
    %c0_i32_0 = arith.constant 0 : i32
    %c0_i32_1 = arith.constant 0 : i32
    return %c0_i32, %c0_i32_0 : i32, i32
  }
  func.func @transform_5(%arg0: i32) -> (i32, i32, i32) {
    %c0_i32 = arith.constant 0 : i32
    %c0_i32_0 = arith.constant 0 : i32
    %c0_i32_1 = arith.constant 0 : i32
    return %arg0, %c0_i32, %c0_i32_0 : i32, i32, i32
  }
}

</mosaic_0001>

<bundles_post_ra>
// kernel: tpu_custom_call.1
= control target key start
LH: loop header
LB: loop body
LE: loop exit
PB: predicated region body
PF: predicated region fallthrough
CT: control target
= control target key end

     0   :  { %10 = vsyncpa [#allocation3], 0  ;;  %s1069_s0 = inlined_call_operand.hbm [shape: bf16[2,24,128], index: 0, kind: input, shape index: {}]   ;;  %s1070_s1 = inlined_call_operand.hbm [shape: bf16[128,128], index: 1, kind: input, shape index: {}]   ;;  %s1071_s2 = inlined_call_operand.hbm [shape: bf16[384,128], index: 2, kind: input, shape index: {}]   ;;  %s1072_s3 = inlined_call_operand.hbm [shape: bf16[128,128], index: 3, kind: input, shape index: {}]   ;;  %s1073_s4 = inlined_call_operand.vmem [shape: f32[1,128], index: 4, kind: input, shape index: {}]   ;;  %s1074_s5 = inlined_call_operand.hbm [shape: f32[2,16,128], index: 5, kind: output, shape index: {}]  }
   0x1   :  { %11 = vsyncpa [#allocation6], 0 }
   0x2   :  { %12 = vsyncpa [#allocation9], 0 }
   0x3   :  { %13 = vsyncpa [#allocation4], 0  ;;  %s31_s20 = sshll.u32 %s1070_s1, 4  ;;  %s1002_s21 = smov [#allocation5]   ;;  %s32_s20 = int_to_ptr.hbm [resolvable:$true] %s31_s20 }
   0x4   :  { %s33_s22 = sshll.u32 %s1002_s21, 4  ;;  %s18_s25 = sshll.u32 %s1069_s0, 4  ;;  %s34_s22 = int_to_ptr.vmem [resolvable:$true] %s33_s22  ;;  %s19_s25 = int_to_ptr.hbm [resolvable:$true] %s18_s25 }
   0x5   :  { %s1003_s26 = smov 64   ;;  %s1004_s27 = smov 4  }
   0x6   :  { %39 = dma.hbm_to_vmem [thread:$0]  %s32_s20, 1024, %s34_s22, [#allocation6], %s1003_s26, %s1003_s26, %s1004_s27  }
   0x7   :  { %s1005_s28 = smov [#allocation2]   ;;  %s44_s7 = sshll.u32 %s1071_s2, 4  ;;  %s45_s7 = int_to_ptr.hbm [resolvable:$true] %s44_s7 }
   0x8   :  { %s20_s29 = sshll.u32 %s1005_s28, 4  ;;  %s57_s9 = sshll.u32 %s1072_s3, 4  ;;  %s21_s29 = int_to_ptr.vmem [resolvable:$true] %s20_s29  ;;  %s58_s9 = int_to_ptr.hbm [resolvable:$true] %s57_s9 }
   0x9   :  { %26 = dma.hbm_to_vmem [thread:$0]  %s19_s25, 384, %s21_s29, [#allocation3], %s1003_s26, %s1003_s26, %s1004_s27  }
   0xa   :  { %s1006_s10 = smov [#allocation7]   ;;  %s1007_s0 = smov [#allocation8]  }
   0xb   :  { %s46_s11 = sshll.u32 %s1006_s10, 4  ;;  %s59_s12 = sshll.u32 %s1007_s0, 4  ;;  %s47_s11 = int_to_ptr.vmem [resolvable:$true] %s46_s11  ;;  %s60_s12 = int_to_ptr.vmem [resolvable:$true] %s59_s12 }
   0xc   :  { %52 = dma.hbm_to_vmem [thread:$0]  %s45_s7, 3072, %s47_s11, [#allocation6], %s1003_s26, %s1003_s26, %s1004_s27  }
   0xd   :  { %65 = dma.hbm_to_vmem [thread:$0]  %s58_s9, 1024, %s60_s12, [#allocation9], %s1003_s26, %s1003_s26, %s1004_s27  }
   0xe   :  { %994 = dma.done.wait [#allocation3], 384  }
   0xf   :  { %995 = vsyncadd [#allocation3], 4294966912 }
  0x10   :  { %996 = dma.done.wait [#allocation6], 4096  }
  0x11   :  { %997 = vsyncadd [#allocation6], 4294963200 }
  0x12   :  { %998 = dma.done.wait [#allocation9], 1024  }
  0x13   :  { %999 = vsyncadd [#allocation9], 4294966272  ;;  %v807_v0 = vld [vmem:[#allocation5 + $0x38] sm:$0xff]  ;;  %v806_v1 = vld [vmem:[#allocation5 + $0x30] sm:$0xff]  ;;  %vm235_vm0 = vcmask 1045504   ;;  %vm224_vm1 = vcmask 1046528  }
  0x14   :  { %172 = vmatpush.bf16.msra.mxu0 %v807_v0  ;;  %v805_v2 = vld [vmem:[#allocation5 + $0x28] sm:$0xff]  ;;  %v804_v3 = vld [vmem:[#allocation5 + $0x20] sm:$0xff]  ;;  %v803_v4 = vld [vmem:[#allocation5 + $0x18] sm:$0xff]  ;;  %s618_s16 = sshll.u32 %s1074_s5, 4  ;;  %s1009_s17 = smov 128   ;;  %s619_s16 = int_to_ptr.hbm [resolvable:$true] %s618_s16 }
  0x15   :  { %v802_v5 = vld [vmem:[#allocation5 + $0x10] sm:$0xff]  ;;  %v801_v6 = vld [vmem:[#allocation5 + $0x8] sm:$0xff]  ;;  %v800_v7 = vld [vmem:[#allocation5] sm:$0xff]  ;;  %s1010_s18 = smov 8  }
  0x16   :  { %v841_v8 = vld [vmem:[#allocation2] sm:$0xff]   ;;  %v831_v9 = vld [vmem:[#allocation7 + $0xb8] sm:$0xff]  ;;  %v830_v11 = vld [vmem:[#allocation7 + $0xb0] sm:$0xff] }
  0x17   :  { %v815_v10 = vld [vmem:[#allocation7 + $0x38] sm:$0xff]  ;;  %492 = vmatpush.bf16.msra.mxu3 %v831_v9  ;;  %v848_v12 = vld [vmem:[#allocation2 + $0x8] sm:$0xff]   ;;  %v829_v16 = vld [vmem:[#allocation7 + $0xa8] sm:$0xff] }
  0x18   :  { %173 = vmatpush.bf16.msra.mxu0 %v806_v1  ;;  %454 = vmatpush.bf16.msra.mxu1 %v815_v10  ;;  %v1053_v13 = vld [vmem:[#allocation2 + $0x10] sm:$0xff]  ;;  %v814_v15 = vld [vmem:[#allocation7 + $0x30] sm:$0xff]  ;;  %v813_v18 = vld [vmem:[#allocation7 + $0x28] sm:$0xff] }
  0x19   :  { %v823_v14 = vld [vmem:[#allocation7 + $0x78] sm:$0xff]  ;;  %v822_v17 = vld [vmem:[#allocation7 + $0x70] sm:$0xff]  ;;  %v828_v19 = vld [vmem:[#allocation7 + $0xa0] sm:$0xff] }
  0x1a   :  { %473 = vmatpush.bf16.msra.mxu2 %v823_v14  ;;  %v821_v20 = vld [vmem:[#allocation7 + $0x68] sm:$0xff]  ;;  %v812_v21 = vld [vmem:[#allocation7 + $0x20] sm:$0xff]  ;;  %v827_v22 = vld [vmem:[#allocation7 + $0x98] sm:$0xff] }
  0x1b   :  { %493 = vmatpush.bf16.msra.mxu3 %v830_v11  ;;  %v820_v23 = vld [vmem:[#allocation7 + $0x60] sm:$0xff]  ;;  %v811_v24 = vld [vmem:[#allocation7 + $0x18] sm:$0xff]  ;;  %v826_v25 = vld [vmem:[#allocation7 + $0x90] sm:$0xff] }
  0x1c   :  { %174 = vmatpush.bf16.msra.mxu0 %v805_v2  ;;  %455 = vmatpush.bf16.msra.mxu1 %v814_v15  ;;  %v819_v26 = vld [vmem:[#allocation7 + $0x58] sm:$0xff]  ;;  %v810_v27 = vld [vmem:[#allocation7 + $0x10] sm:$0xff]  ;;  %v825_v28 = vld [vmem:[#allocation7 + $0x88] sm:$0xff] }
  0x1d   :  { %v818_v29 = vld [vmem:[#allocation7 + $0x50] sm:$0xff]  ;;  %v809_v30 = vld [vmem:[#allocation7 + $0x8] sm:$0xff]  ;;  %v824_v31 = vld [vmem:[#allocation7 + $0x80] sm:$0xff] }
  0x1e   :  { %474 = vmatpush.bf16.msra.mxu2 %v822_v17  ;;  %v817_v32 = vld [vmem:[#allocation7 + $0x48] sm:$0xff]  ;;  %v808_v33 = vld [vmem:[#allocation7] sm:$0xff]  ;;  %v839_v36 = vld [vmem:[#allocation8 + $0x38] sm:$0xff] }
  0x1f   :  { %494 = vmatpush.bf16.msra.mxu3 %v829_v16  ;;  %v816_v34 = vld [vmem:[#allocation7 + $0x40] sm:$0xff]  ;;  %v838_v37 = vld [vmem:[#allocation8 + $0x30] sm:$0xff]  ;;  %v837_v41 = vld [vmem:[#allocation8 + $0x28] sm:$0xff] }
  0x20   :  { %175 = vmatpush.bf16.msra.mxu0 %v804_v3  ;;  %456 = vmatpush.bf16.msra.mxu1 %v813_v18  ;;  %v836_v44 = vld [vmem:[#allocation8 + $0x20] sm:$0xff]  ;;  %v835_v50 = vld [vmem:[#allocation8 + $0x18] sm:$0xff]  ;;  %v834_v55 = vld [vmem:[#allocation8 + $0x10] sm:$0xff] }
  0x21   :  { %v833_v61 = vld [vmem:[#allocation8 + $0x8] sm:$0xff]  ;;  %v832_v2 = vld [vmem:[#allocation8] sm:$0xff] }
  0x22   :  { %475 = vmatpush.bf16.msra.mxu2 %v821_v20 }
  0x23   :  { %495 = vmatpush.bf16.msra.mxu3 %v828_v19 }
  0x24   :  { %176 = vmatpush.bf16.msra.mxu0 %v803_v4  ;;  %457 = vmatpush.bf16.msra.mxu1 %v812_v21 }
  0x26   :  { %476 = vmatpush.bf16.msra.mxu2 %v820_v23 }
  0x27   :  { %496 = vmatpush.bf16.msra.mxu3 %v827_v22 }
  0x28   :  { %177 = vmatpush.bf16.msra.mxu0 %v802_v5  ;;  %458 = vmatpush.bf16.msra.mxu1 %v811_v24 }
  0x2a   :  { %477 = vmatpush.bf16.msra.mxu2 %v819_v26 }
  0x2b   :  { %497 = vmatpush.bf16.msra.mxu3 %v826_v25 }
  0x2c   :  { %178 = vmatpush.bf16.msra.mxu0 %v801_v6  ;;  %459 = vmatpush.bf16.msra.mxu1 %v810_v27 }
  0x2e   :  { %478 = vmatpush.bf16.msra.mxu2 %v818_v29 }
  0x2f   :  { %498 = vmatpush.bf16.msra.mxu3 %v825_v28  ;;  %v855_v28 = vld [vmem:[#allocation2 + $0x4] sm:$0xff]  }
  0x30   :  { %179 = vmatpush.bf16.msra.mxu0 %v800_v7  ;;  %460 = vmatpush.bf16.msra.mxu1 %v809_v30 }
  0x32   :  { %479 = vmatpush.bf16.msra.mxu2 %v817_v32 }
  0x33   :  { %180 = vmatmul.bf16.vlgmr.msra.gmra.mxu0 %v841_v8  ;;  %499 = vmatpush.bf16.msra.mxu3 %v824_v31 }
  0x34   :  { %461 = vmatpush.bf16.msra.mxu1 %v808_v33 }
  0x36   :  { %480 = vmatpush.bf16.msra.mxu2 %v816_v34  ;;  %v873_v34 = vld [vmem:[%s1073_s4] ss:$0 sm:$0xff]  ;;  %s1008_s4 = smov [#allocation10]  }
  0x37   :  { %s616_s13 = sshll.u32 %s1008_s4, 4  ;;  %s617_s13 = int_to_ptr.vmem [resolvable:$true] %s616_s13 }
  0x38   :  { %581 = vmatpush.bf16.msrb.mxu1 %v839_v36 }
  0x3a   :  { %856 = vmatpush.bf16.msrb.mxu2 %v839_v36 }
  0x3c   :  { %582 = vmatpush.bf16.msrb.mxu1 %v838_v37 }
  0x3e   :  { %857 = vmatpush.bf16.msrb.mxu2 %v838_v37 }
  0x40   :  { %583 = vmatpush.bf16.msrb.mxu1 %v837_v41 }
  0x42   :  { %858 = vmatpush.bf16.msrb.mxu2 %v837_v41 }
  0x43   :  { %185 = vmatmul.bf16.gmra.mxu0 %v848_v12 }
  0x44   :  { %584 = vmatpush.bf16.msrb.mxu1 %v836_v44 }
  0x46   :  { %859 = vmatpush.bf16.msrb.mxu2 %v836_v44 }
  0x48   :  { %585 = vmatpush.bf16.msrb.mxu1 %v835_v50 }
  0x4a   :  { %860 = vmatpush.bf16.msrb.mxu2 %v835_v50 }
  0x4c   :  { %586 = vmatpush.bf16.msrb.mxu1 %v834_v55 }
  0x4e   :  { %861 = vmatpush.bf16.msrb.mxu2 %v834_v55 }
  0x50   :  { %587 = vmatpush.bf16.msrb.mxu1 %v833_v61 }
  0x52   :  { %862 = vmatpush.bf16.msrb.mxu2 %v833_v61 }
  0x53   :  { %190 = vmatmul.bf16.gmra.mxu0 %v1053_v13 }
  0x54   :  { %588 = vmatpush.bf16.msrb.mxu1 %v832_v2 }
  0x56   :  { %863 = vmatpush.bf16.msrb.mxu2 %v832_v2 }
  0xb0   :  { %v181_v35 = vpop.f32.mrf.mxu0 }
  0xb1   :  { %v196_v40 = vmax.f32 %v181_v35, 0.0 }
  0xb3   :  { %v202_v43 = vpack.c.bf16 %v196_v40, %v196_v40 }
  0xb5   :  { %v214_v48 = vunpack.c.l.b16 %v202_v43 }
  0xb8   :  { %v183_v38 = vpop.f32.mrf.mxu0 }
  0xb9   :  { %v197_v39 = vmax.f32 %v183_v38, 0.0 }
  0xbb   :  { %v203_v42 = vpack.c.bf16 %v197_v39, %v197_v39 }
  0xbd   :  { %v215_v46 = vunpack.c.l.b16 %v203_v42 }
  0xbf   :  { %v220_v51 = vpack.c.b16 %v215_v46, %v214_v48 }
  0xc0   :  { %v186_v45 = vpop.f32.mrf.mxu0 }
  0xc1   :  { %v198_v47 = vmax.f32 %v186_v45, 0.0  ;;  %v225_v57 = vrot.slane %v220_v51, 1  ;;  %v236_v59 = vrot.slane %v220_v51, 2 }
  0xc3   :  { %v204_v49 = vpack.c.bf16 %v198_v47, %v198_v47 }
  0xc5   :  { %v216_v52 = vunpack.c.l.b16 %v204_v49 }
  0xc7   :  { %v221_v53 = vpack.c.b16 %v216_v52, %v216_v52  ;;  %v231_v54 = vpack.c.b16 %v216_v52, %v215_v46 }
  0xc8   :  { %v188_v56 = vpop.f32.mrf.mxu0 }
  0xc9   :  { %v226_v58 = vrot.slane %v221_v53, 1  ;;  %500 = vmatmul.bf16.vlgmr.msra.gmra.mxu3 %v231_v54  ;;  %v237_v60 = vrot.slane %v221_v53, 2  ;;  %v199_v6 = vmax.f32 %v188_v56, 0.0 }
  0xcb   :  { %v238_v62 = vsel %vm235_vm0, %v236_v59, %v237_v60  ;;  %v227_v63 = vsel %vm224_vm1, %v225_v57, %v226_v58  ;;  %v240_v0 = vrot.slane %v226_v58, 2  ;;  %v205_v8 = vpack.c.bf16 %v199_v6, %v199_v6 }
  0xcc   :  { %462 = vmatmul.bf16.vlgmr.msra.gmra.mxu1 %v238_v62  ;;  %v239_v1 = vrot.slane %v227_v63, 2 }
  0xcd   :  { %v217_v12 = vunpack.c.l.b16 %v205_v8 }
  0xce   :  { %v241_v3 = vsel %vm235_vm0, %v239_v1, %v240_v0 }
  0xcf   :  { %481 = vmatmul.bf16.vlgmr.msra.gmra.mxu2 %v241_v3 }
  0xd0   :  { %v191_v4 = vpop.f32.mrf.mxu0 }
  0xd1   :  { %v200_v5 = vmax.f32 %v191_v4, 0.0 }
  0xd3   :  { %v206_v7 = vpack.c.bf16 %v200_v5, %v200_v5 }
  0xd5   :  { %v218_v10 = vunpack.c.l.b16 %v206_v7 }
  0xd7   :  { %v222_v15 = vpack.c.b16 %v218_v10, %v217_v12 }
  0xd8   :  { %v193_v9 = vpop.f32.mrf.mxu0 }
  0xd9   :  { %v201_v11 = vmax.f32 %v193_v9, 0.0  ;;  %v228_v19 = vrot.slane %v222_v15, 1  ;;  %v244_v22 = vrot.slane %v222_v15, 2 }
  0xdb   :  { %v207_v14 = vpack.c.bf16 %v201_v11, %v201_v11 }
  0xdd   :  { %v219_v16 = vunpack.c.l.b16 %v207_v14 }
  0xdf   :  { %v223_v17 = vpack.c.b16 %v219_v16, %v219_v16  ;;  %v232_v18 = vpack.c.b16 %v219_v16, %v218_v10 }
  0xe1   :  { %v229_v20 = vrot.slane %v223_v17, 1  ;;  %v245_v21 = vrot.slane %v223_v17, 2  ;;  %505 = vmatmul.bf16.gmra.mxu3 %v232_v18 }
  0xe3   :  { %v246_v23 = vsel %vm235_vm0, %v244_v22, %v245_v21  ;;  %v230_v24 = vsel %vm224_vm1, %v228_v19, %v229_v20  ;;  %v248_v25 = vrot.slane %v229_v20, 2 }
  0xe4   :  { %467 = vmatmul.bf16.gmra.mxu1 %v246_v23  ;;  %v247_v26 = vrot.slane %v230_v24, 2 }
  0xe6   :  { %v249_v27 = vsel %vm235_vm0, %v247_v26, %v248_v25 }
  0xe7   :  { %486 = vmatmul.bf16.gmra.mxu2 %v249_v27 }
  0xf4   :  { %589 = vmatmul.bf16.vlgmr.msrb.gmra.mxu1 %v855_v28 }
  0xf7   :  { %594 = vmatmul.bf16.vlgmr.msrb.gmra.mxu2 %v1053_v13 }
 0x149   :  { %v463_v29 = vpop.f32.mrf.mxu1 }
 0x14a   :  { %v464_v36 = vadd.f32 %v873_v34, %v463_v29 }
 0x14c   :  { %v501_v32 = vpop.f32.mrf.mxu3 }
 0x151   :  { %v465_v31 = vpop.f32.mrf.mxu1 }
 0x152   :  { %v482_v30 = vpop.f32.mrf.mxu2  ;;  %v466_v42 = vadd.f32 %v873_v34, %v465_v31 }
 0x153   :  { %v483_v37 = vadd.f32 %v482_v30, %v464_v36 }
 0x154   :  { %v503_v39 = vpop.f32.mrf.mxu3 }
 0x155   :  { %v502_v41 = vadd.f32 %v501_v32, %v483_v37 }
 0x157   :  { %v511_v13 = vmax.f32 %v502_v41, 0.0 }
 0x15a   :  { %v484_v35 = vpop.f32.mrf.mxu2 }
 0x15b   :  { %v485_v44 = vadd.f32 %v484_v35, %v466_v42 }
 0x15d   :  { %v504_v50 = vadd.f32 %v503_v39, %v485_v44 }
 0x15f   :  { %v512_v54 = vmax.f32 %v504_v50, 0.0 }
 0x161   :  { %v468_v33 = vpop.f32.mrf.mxu1 }
 0x162   :  { %v469_v43 = vadd.f32 %v873_v34, %v468_v33 }
 0x164   :  { %v506_v47 = vpop.f32.mrf.mxu3 }
 0x169   :  { %v470_v38 = vpop.f32.mrf.mxu1 }
 0x16a   :  { %v487_v40 = vpop.f32.mrf.mxu2  ;;  %v471_v53 = vadd.f32 %v873_v34, %v470_v38 }
 0x16b   :  { %v488_v45 = vadd.f32 %v487_v40, %v469_v43 }
 0x16c   :  { %v508_v61 = vpop.f32.mrf.mxu3 }
 0x16d   :  { %v507_v52 = vadd.f32 %v506_v47, %v488_v45 }
 0x16f   :  { %v513_v57 = vmax.f32 %v507_v52, 0.0 }
 0x171   :  { %v590_v46 = vpop.f32.mrf.mxu1 }
 0x172   :  { %v600_v48 = vadd.f32 %v590_v46, %v511_v13  ;;  %v489_v49 = vpop.f32.mrf.mxu2 }
 0x173   :  { %v490_v55 = vadd.f32 %v489_v49, %v471_v53 }
 0x174   :  { %v604_v51 = vmax.f32 %v600_v48, 0.0 }
 0x175   :  { %v509_v63 = vadd.f32 %v508_v61, %v490_v55 }
 0x176   :  { %608 = vst [vmem:[#allocation10] sm:$0xff] %v604_v51 }
 0x177   :  { %v514_v1 = vmax.f32 %v509_v63, 0.0 }
 0x179   :  { %v592_v56 = vpop.f32.mrf.mxu1 }
 0x17a   :  { %v601_v58 = vadd.f32 %v592_v56, %v512_v54  ;;  %v595_v59 = vpop.f32.mrf.mxu2 }
 0x17b   :  { %v602_v60 = vadd.f32 %v595_v59, %v513_v57 }
 0x17c   :  { %v605_v62 = vmax.f32 %v601_v58, 0.0 }
 0x17d   :  { %v606_v0 = vmax.f32 %v602_v60, 0.0 }
 0x17e   :  { %609 = vst [vmem:[#allocation10 + $0x8] sm:$0xff] %v605_v62 }
 0x17f   :  { %610 = vst [vmem:[#allocation10 + $0x10] sm:$0xff] %v606_v0 }
 0x182   :  { %v597_v2 = vpop.f32.mrf.mxu2 }
 0x183   :  { %v603_v3 = vadd.f32 %v597_v2, %v514_v1 }
 0x185   :  { %v607_v4 = vmax.f32 %v603_v3, 0.0 }
 0x187   :  { %611 = vst [vmem:[#allocation10 + $0x18] sm:$0xff] %v607_v4 }
 0x188   :  { %624 = dma.vmem_to_hbm [thread:$0]  %s617_s13, 512, %s619_s16, [#allocation4], %s1009_s17, %s1009_s17, %s1010_s18  }
 0x189   :  { %1000 = dma.done.wait [#allocation4], 512  }
 0x18a   :  { %1001 = vsyncadd [#allocation4], 4294966784 }
 0x18b   :  { %629 = vsyncpa [#allocation3], 1 }
 0x18c   :  { %630 = vsyncpa [#allocation6], 1 }
 0x18d   :  { %631 = vsyncpa [#allocation9], 1 }
 0x18e   :  { %632 = vsyncpa [#allocation4], 1 }

</bundles_post_ra>
